<compile_context>
chip_gen: v5e
topology: v5e:2x2
jax: 0.10.0
libtpu: 0.0.40
codegen_flags: <defaults>
</compile_context>

<pallas_src>
import functools

import jax
import jax.numpy as jnp
from jax import lax
from jax.experimental import pallas as pl
from jax.experimental.pallas import tpu as pltpu


def _rnn_kernel(x_ref, wih_ref, whh_ref, b_ref, wlin_ref, blin_ref, out_ref,
                *, seq_len, batch_pad):
    # x_ref:    (T*Bp, I)  time-major input, flattened over (T, Bp), Bp % 8 == 0
    # wih_ref:  (I, H)     = W_ih^T
    # whh_ref:  (H, H)     = W_hh^T
    # b_ref:    (1, H)     = b_ih + b_hh
    # wlin_ref: (O, H)     = W_lin (PyTorch layout; contracted on last axis)
    # blin_ref: (1, O)
    # out_ref:  (T*Bp, O)
    T = seq_len
    Bp = batch_pad
    I = x_ref.shape[1]
    H = whh_ref.shape[0]
    O = out_ref.shape[1]

    # (1) Input projection for every timestep, off the serial chain.
    #     input_size == 1 -> degenerate K=1 matmul: do it on the VPU instead
    #     (broadcast multiply), keeping the MXU free for the recurrence.
    if I == 1:
        xw = x_ref[...] * wih_ref[...] + b_ref[...]               # (T*Bp, H)
    else:
        xw = (jnp.dot(x_ref[...], wih_ref[...],
                      preferred_element_type=jnp.float32)
              + b_ref[...])                                       # (T*Bp, H)

    # (2) Recurrent weight loaded once, outside the loop.
    whh = whh_ref[...]                                            # (H, H)

    # (3) Serial recurrence, statically unrolled (T is a Python int); the
    #     hidden-state history stays in vregs (T*Bp*H*4 bytes ~= a few vregs),
    #     so there are no per-step masked VMEM stores on the critical path.
    h = jnp.zeros((Bp, H), jnp.float32)
    hs = []
    for t in range(T):
        h = jnp.tanh(xw[t * Bp:(t + 1) * Bp, :]
                     + jnp.dot(h, whh, preferred_element_type=jnp.float32))
        hs.append(h)
    hs_all = jnp.concatenate(hs, axis=0)                          # (T*Bp, H)

    # (4) Output Linear + tanh. output_size == 1 -> degenerate N=1 matmul:
    #     elementwise multiply + cross-lane sum (XLU) instead of the MXU.
    if O == 1:
        y = jnp.tanh(jnp.sum(hs_all * wlin_ref[...], axis=-1, keepdims=True)
                     + blin_ref[...])                             # (T*Bp, 1)
    else:
        y = jnp.tanh(lax.dot_general(hs_all, wlin_ref[...],
                                     (((1,), (1,)), ((), ())),
                                     preferred_element_type=jnp.float32)
                     + blin_ref[...])                             # (T*Bp, O)

    # One bulk store.
    out_ref[...] = y.astype(out_ref.dtype)


def prepare_params(params):
    """One-time (out of the per-call path) weight preparation."""
    w_ih = params["w_ih"]    # (H, I)
    w_hh = params["w_hh"]    # (H, H)
    b_ih = params["b_ih"]    # (H,)
    b_hh = params["b_hh"]    # (H,)
    w_lin = params["w_lin"]  # (O, H)
    b_lin = params["b_lin"]  # (O,)
    H = w_hh.shape[0]
    O = w_lin.shape[0]
    return {
        "wih": jnp.transpose(w_ih).astype(jnp.float32),           # (I, H)
        "whh": jnp.transpose(w_hh).astype(jnp.float32),           # (H, H)
        "b": (b_ih + b_hh).reshape(1, H).astype(jnp.float32),     # (1, H)
        "wlin": w_lin.astype(jnp.float32),                        # (O, H)
        "blin": b_lin.reshape(1, O).astype(jnp.float32),          # (1, O)
    }


@jax.jit
def rnn_model_forward(x, prep):
    """Pallas forward. x: (B, T, I) f32 -> (B, T, O) f32."""
    B, T, I = x.shape
    H = prep["whh"].shape[0]
    O = prep["wlin"].shape[0]

    # Pad batch to a multiple of 8 sublanes so every per-step slice / the bulk
    # store is (8,128)-tile aligned.  Batch rows of an RNN are independent, so
    # the zero-padded rows are sliced off afterwards without affecting results.
    Bp = max(8, ((B + 7) // 8) * 8)

    # Tiny layout plumbing, fused into this single jitted dispatch.
    x_tb = jnp.transpose(x, (1, 0, 2)).astype(jnp.float32)        # (T, B, I)
    if Bp != B:
        x_tb = jnp.pad(x_tb, ((0, 0), (0, Bp - B), (0, 0)))
    x_flat = x_tb.reshape(T * Bp, I)                              # (T*Bp, I)

    kernel = functools.partial(_rnn_kernel, seq_len=T, batch_pad=Bp)
    vmem = pl.BlockSpec(memory_space=pltpu.MemorySpace.VMEM)

    flops = 2 * T * Bp * (I * H + H * H + H * O)
    transcendentals = T * Bp * (H + O)
    bytes_accessed = 4 * (T * Bp * I + I * H + H * H + H
                          + O * H + O + T * Bp * O)

    # Everything stays resident in VMEM; the serial recurrence runs inside one
    # grid-less kernel invocation at these sizes (splitting 2 KiB of work
    # across a grid / two TensorCores would be pure overhead).
    out_flat = pl.pallas_call(
        kernel,
        out_shape=jax.ShapeDtypeStruct((T * Bp, O), jnp.float32),
        in_specs=[vmem] * 6,
        out_specs=vmem,
        cost_estimate=pl.CostEstimate(flops=flops,
                                      transcendentals=transcendentals,
                                      bytes_accessed=bytes_accessed),
    )(x_flat, prep["wih"], prep["whh"], prep["b"], prep["wlin"], prep["blin"])

    out = out_flat.reshape(T, Bp, O)[:, :B, :]                    # (T, B, O)
    return jnp.transpose(out, (1, 0, 2))                          # (B, T, O)


def rnn_model_ref(x, params):
    """Pure-JAX reference matching the PyTorch forward."""
    w_ih, w_hh = params["w_ih"], params["w_hh"]
    b_ih, b_hh = params["b_ih"], params["b_hh"]
    w_lin, b_lin = params["w_lin"], params["b_lin"]
    B = x.shape[0]
    H = w_hh.shape[0]
    x_tb = jnp.transpose(x, (1, 0, 2))                            # (T, B, I)

    def step(h, x_t):
        h_new = jnp.tanh(x_t @ w_ih.T + b_ih + h @ w_hh.T + b_hh)
        return h_new, h_new

    _, hs = lax.scan(step, jnp.zeros((B, H), jnp.float32), x_tb)  # (T, B, H)
    out = jnp.tanh(hs @ w_lin.T + b_lin)                          # (T, B, O)
    return jnp.transpose(out, (1, 0, 2))


def init_params(key, input_size=1, hidden_size=32, output_size=1):
    """Deterministic init mirroring PyTorch's U(-1/sqrt(H), 1/sqrt(H))."""
    k = 1.0 / jnp.sqrt(jnp.float32(hidden_size))
    ks = jax.random.split(key, 6)
    return {
        "w_ih": jax.random.uniform(ks[0], (hidden_size, input_size),
                                   jnp.float32, -k, k),
        "w_hh": jax.random.uniform(ks[1], (hidden_size, hidden_size),
                                   jnp.float32, -k, k),
        "b_ih": jax.random.uniform(ks[2], (hidden_size,),
                                   jnp.float32, -k, k),
        "b_hh": jax.random.uniform(ks[3], (hidden_size,),
                                   jnp.float32, -k, k),
        "w_lin": jax.random.uniform(ks[4], (output_size, hidden_size),
                                    jnp.float32, -k, k),
        "b_lin": jax.random.uniform(ks[5], (output_size,),
                                    jnp.float32, -k, k),
    }


if __name__ == "__main__":
    key = jax.random.PRNGKey(0)
    k_param, k_x = jax.random.split(key)

    batch, seq, input_size, hidden_size, output_size = 2, 8, 1, 32, 1
    params = init_params(k_param, input_size, hidden_size, output_size)
    x = jax.random.normal(k_x, (batch, seq, input_size), jnp.float32)

    prep = prepare_params(params)   # one-time, outside the per-call path
    out = jax.block_until_ready(rnn_model_forward(x, prep))
    ref = jax.block_until_ready(rnn_model_ref(x, params))

    assert out.shape == (batch, seq, output_size), out.shape
    assert jnp.allclose(out, ref, atol=1e-5, rtol=1e-5), \
        f"max abs diff {jnp.max(jnp.abs(out - ref))}"
    print("KERNEL_OK")
</pallas_src>

<mosaic_0001>
module attributes {stable_mosaic.version = 11 : i64} {
  func.func @_rnn_kernel(%arg0: memref<64x1xf32, #tpu.memory_space<vmem>>, %arg1: memref<1x32xf32, #tpu.memory_space<vmem>>, %arg2: memref<32x32xf32, #tpu.memory_space<vmem>>, %arg3: memref<1x32xf32, #tpu.memory_space<vmem>>, %arg4: memref<1x32xf32, #tpu.memory_space<vmem>>, %arg5: memref<1x1xf32, #tpu.memory_space<vmem>>, %arg6: memref<64x1xf32, #tpu.memory_space<vmem>>) attributes {dimension_semantics = [], scalar_prefetch = 0 : i64, scratch_operands = 0 : i64, tpu.core_type = #tpu.core_type<tc>} {
    %c0 = arith.constant 0 : index
    %c0_0 = arith.constant 0 : index
    %0 = vector.load %arg0[%c0, %c0_0] : memref<64x1xf32, #tpu.memory_space<vmem>>, vector<64x1xf32>
    %c0_1 = arith.constant 0 : index
    %c0_2 = arith.constant 0 : index
    %1 = vector.load %arg1[%c0_1, %c0_2] : memref<1x32xf32, #tpu.memory_space<vmem>>, vector<1x32xf32>
    %2 = vector.broadcast %0 : vector<64x1xf32> to vector<64x32xf32>
    %3 = vector.broadcast %1 : vector<1x32xf32> to vector<64x32xf32>
    %4 = arith.mulf %2, %3 : vector<64x32xf32>
    %c0_3 = arith.constant 0 : index
    %c0_4 = arith.constant 0 : index
    %5 = vector.load %arg3[%c0_3, %c0_4] : memref<1x32xf32, #tpu.memory_space<vmem>>, vector<1x32xf32>
    %6 = vector.broadcast %5 : vector<1x32xf32> to vector<64x32xf32>
    %7 = arith.addf %4, %6 : vector<64x32xf32>
    %c0_5 = arith.constant 0 : index
    %c0_6 = arith.constant 0 : index
    %8 = vector.load %arg2[%c0_5, %c0_6] : memref<32x32xf32, #tpu.memory_space<vmem>>, vector<32x32xf32>
    %cst = arith.constant 0.000000e+00 : f32
    %9 = vector.broadcast %cst : f32 to vector<8x32xf32>
    %10 = vector.extract_strided_slice %7 {offsets = [0, 0], sizes = [8, 32], strides = [1, 1]} : vector<64x32xf32> to vector<8x32xf32>
    %cst_7 = arith.constant dense<0.000000e+00> : vector<8x32xf32>
    %11 = tpu.matmul %9, %8, %cst_7 {dimension_numbers = #tpu.dot_dimension_numbers<[1], [0], [0], [1], [0, 0, 1, 1], [], []>} : vector<8x32xf32>, vector<32x32xf32>, vector<8x32xf32> -> vector<8x32xf32>
    %12 = arith.addf %10, %11 : vector<8x32xf32>
    %13 = math.tanh %12 : vector<8x32xf32>
    %14 = vector.extract_strided_slice %7 {offsets = [8, 0], sizes = [8, 32], strides = [1, 1]} : vector<64x32xf32> to vector<8x32xf32>
    %cst_8 = arith.constant dense<0.000000e+00> : vector<8x32xf32>
    %15 = tpu.matmul %13, %8, %cst_8 {dimension_numbers = #tpu.dot_dimension_numbers<[1], [0], [0], [1], [0, 0, 1, 1], [], []>} : vector<8x32xf32>, vector<32x32xf32>, vector<8x32xf32> -> vector<8x32xf32>
    %16 = arith.addf %14, %15 : vector<8x32xf32>
    %17 = math.tanh %16 : vector<8x32xf32>
    %18 = vector.extract_strided_slice %7 {offsets = [16, 0], sizes = [8, 32], strides = [1, 1]} : vector<64x32xf32> to vector<8x32xf32>
    %cst_9 = arith.constant dense<0.000000e+00> : vector<8x32xf32>
    %19 = tpu.matmul %17, %8, %cst_9 {dimension_numbers = #tpu.dot_dimension_numbers<[1], [0], [0], [1], [0, 0, 1, 1], [], []>} : vector<8x32xf32>, vector<32x32xf32>, vector<8x32xf32> -> vector<8x32xf32>
    %20 = arith.addf %18, %19 : vector<8x32xf32>
    %21 = math.tanh %20 : vector<8x32xf32>
    %22 = vector.extract_strided_slice %7 {offsets = [24, 0], sizes = [8, 32], strides = [1, 1]} : vector<64x32xf32> to vector<8x32xf32>
    %cst_10 = arith.constant dense<0.000000e+00> : vector<8x32xf32>
    %23 = tpu.matmul %21, %8, %cst_10 {dimension_numbers = #tpu.dot_dimension_numbers<[1], [0], [0], [1], [0, 0, 1, 1], [], []>} : vector<8x32xf32>, vector<32x32xf32>, vector<8x32xf32> -> vector<8x32xf32>
    %24 = arith.addf %22, %23 : vector<8x32xf32>
    %25 = math.tanh %24 : vector<8x32xf32>
    %26 = vector.extract_strided_slice %7 {offsets = [32, 0], sizes = [8, 32], strides = [1, 1]} : vector<64x32xf32> to vector<8x32xf32>
    %cst_11 = arith.constant dense<0.000000e+00> : vector<8x32xf32>
    %27 = tpu.matmul %25, %8, %cst_11 {dimension_numbers = #tpu.dot_dimension_numbers<[1], [0], [0], [1], [0, 0, 1, 1], [], []>} : vector<8x32xf32>, vector<32x32xf32>, vector<8x32xf32> -> vector<8x32xf32>
    %28 = arith.addf %26, %27 : vector<8x32xf32>
    %29 = math.tanh %28 : vector<8x32xf32>
    %30 = vector.extract_strided_slice %7 {offsets = [40, 0], sizes = [8, 32], strides = [1, 1]} : vector<64x32xf32> to vector<8x32xf32>
    %cst_12 = arith.constant dense<0.000000e+00> : vector<8x32xf32>
    %31 = tpu.matmul %29, %8, %cst_12 {dimension_numbers = #tpu.dot_dimension_numbers<[1], [0], [0], [1], [0, 0, 1, 1], [], []>} : vector<8x32xf32>, vector<32x32xf32>, vector<8x32xf32> -> vector<8x32xf32>
    %32 = arith.addf %30, %31 : vector<8x32xf32>
    %33 = math.tanh %32 : vector<8x32xf32>
    %34 = vector.extract_strided_slice %7 {offsets = [48, 0], sizes = [8, 32], strides = [1, 1]} : vector<64x32xf32> to vector<8x32xf32>
    %cst_13 = arith.constant dense<0.000000e+00> : vector<8x32xf32>
    %35 = tpu.matmul %33, %8, %cst_13 {dimension_numbers = #tpu.dot_dimension_numbers<[1], [0], [0], [1], [0, 0, 1, 1], [], []>} : vector<8x32xf32>, vector<32x32xf32>, vector<8x32xf32> -> vector<8x32xf32>
    %36 = arith.addf %34, %35 : vector<8x32xf32>
    %37 = math.tanh %36 : vector<8x32xf32>
    %38 = vector.extract_strided_slice %7 {offsets = [56, 0], sizes = [8, 32], strides = [1, 1]} : vector<64x32xf32> to vector<8x32xf32>
    %cst_14 = arith.constant dense<0.000000e+00> : vector<8x32xf32>
    %39 = tpu.matmul %37, %8, %cst_14 {dimension_numbers = #tpu.dot_dimension_numbers<[1], [0], [0], [1], [0, 0, 1, 1], [], []>} : vector<8x32xf32>, vector<32x32xf32>, vector<8x32xf32> -> vector<8x32xf32>
    %40 = arith.addf %38, %39 : vector<8x32xf32>
    %41 = math.tanh %40 : vector<8x32xf32>
    %42 = tpu.concatenate %13, %17, %21, %25, %29, %33, %37, %41 in 0 : vector<8x32xf32>, vector<8x32xf32>, vector<8x32xf32>, vector<8x32xf32>, vector<8x32xf32>, vector<8x32xf32>, vector<8x32xf32>, vector<8x32xf32> -> vector<64x32xf32>
    %c0_15 = arith.constant 0 : index
    %c0_16 = arith.constant 0 : index
    %43 = vector.load %arg4[%c0_15, %c0_16] : memref<1x32xf32, #tpu.memory_space<vmem>>, vector<1x32xf32>
    %44 = vector.broadcast %43 : vector<1x32xf32> to vector<64x32xf32>
    %45 = arith.mulf %42, %44 : vector<64x32xf32>
    %cst_17 = arith.constant dense<0.000000e+00> : vector<64xf32>
    %46 = vector.multi_reduction <add>, %45, %cst_17 [1] : vector<64x32xf32> to vector<64xf32>
    %47 = vector.shape_cast %46 : vector<64xf32> to vector<64x1xf32>
    %c0_18 = arith.constant 0 : index
    %c0_19 = arith.constant 0 : index
    %48 = vector.load %arg5[%c0_18, %c0_19] : memref<1x1xf32, #tpu.memory_space<vmem>>, vector<1x1xf32>
    %49 = vector.broadcast %48 : vector<1x1xf32> to vector<64x1xf32>
    %50 = arith.addf %47, %49 : vector<64x1xf32>
    %51 = math.tanh %50 : vector<64x1xf32>
    %c0_20 = arith.constant 0 : index
    %c0_21 = arith.constant 0 : index
    %52 = vector.load %arg6[%c0_20, %c0_21] : memref<64x1xf32, #tpu.memory_space<vmem>>, vector<64x1xf32>
    tpu.vector_store %arg6[%c0_20, %c0_21], %51 {strides = array<i32>} : memref<64x1xf32, #tpu.memory_space<vmem>>, vector<64x1xf32>,
    return
  }
}

</mosaic_0001>

<bundles_post_ra>
// kernel: rnn_model_forward.1
= control target key start
LH: loop header
LB: loop body
LE: loop exit
PB: predicated region body
PF: predicated region fallthrough
CT: control target
= control target key end

     0   :  { %v419_v0 = vmov 0   ;;  %v420_v8 = vmov 0.0   ;;  %vm101_vm0 = vcmask 261120   ;;  %vm358_vm1 = vcmask 7168   ;;  %s600_s2 = inlined_call_operand.vmem [shape: f32[32,32], index: 2, kind: input, shape index: {}]   ;;  %s601_s0 = inlined_call_operand.vmem [shape: f32[64,1], index: 0, kind: input, shape index: {}]   ;;  %s602_s1 = inlined_call_operand.vmem [shape: f32[1,32], index: 1, kind: input, shape index: {}]   ;;  %s603_s3 = inlined_call_operand.vmem [shape: f32[1,32], index: 3, kind: input, shape index: {}]   ;;  %s604_s4 = inlined_call_operand.vmem [shape: f32[1,32], index: 4, kind: input, shape index: {}]   ;;  %s605_s5 = inlined_call_operand.<no memory space> [shape: f32[1,1], index: 5, kind: input, shape index: {}]   ;;  %s606_s6 = inlined_call_operand.vmem [shape: f32[64,1], index: 6, kind: output, shape index: {}]  }
   0x1   :  { %380 = vset.pattern.permute.xlu0 %v419_v0  ;;  %v100_v1 = vld [vmem:[%s600_s2 + $0x18] sm:$0xff]  ;;  %v25_v2 = vld [vmem:[%s601_s0] sm:$0xff]  ;;  %v99_v3 = vld [vmem:[%s600_s2 + $0x10] sm:$0xff]  ;;  %382 = vset.pattern.permute.xlu2 %v419_v0  ;;  %v11_v11 = vstv %s605_s5 }
   0x2   :  { %117 = vmatpush.msra.mxu0 %v100_v1  ;;  %36 = vperm.xlu0 %380, %v25_v2   ;;  %v98_v4 = vld [vmem:[%s600_s2 + $0x8] sm:$0xff]  ;;  %v29_v5 = vld [vmem:[%s601_s0 + $0x20] sm:$0xff]  ;;  %v31_v10 = vld [vmem:[%s601_s0 + $0x30] sm:$0xff]  ;;  %12 = vst [vmem:[#allocation2] sm:$0x1] %v11_v11 }
   0x3   :  { %142 = vmatpush.msra.mxu1 %v100_v1  ;;  %167 = vmatpush.msra.mxu2 %v100_v1  ;;  %v97_v6 = vld [vmem:[%s600_s2] sm:$0xff]  ;;  %v26_v7 = vld [vmem:[%s601_s0 + $0x8] sm:$0xff]  ;;  %v27_v23 = vld [vmem:[%s601_s0 + $0x10] sm:$0xff] }
   0x4   :  { %118 = vmatpush.msra.mxu0 %v99_v3  ;;  %56 = vperm.xlu2 %382, %v29_v5   ;;  %v30_v9 = vld [vmem:[%s601_s0 + $0x28] sm:$0xff]  ;;  %v489_v12 = vld [vmem:[%s602_s1] ss:$0 sm:$0xff]  ;;  %v28_v25 = vld [vmem:[%s601_s0 + $0x18] sm:$0xff] }
   0x5   :  { %143 = vmatpush.msra.mxu1 %v99_v3  ;;  %168 = vmatpush.msra.mxu2 %v99_v3  ;;  %v495_v15 = vld [vmem:[%s603_s3] ss:$0 sm:$0xff]  ;;  %v32_v27 = vld [vmem:[%s601_s0 + $0x38] sm:$0xff] }
   0x6   :  { %119 = vmatpush.msra.mxu0 %v98_v4  ;;  %381 = vset.pattern.permute.xlu1 %v419_v0  ;;  %v501_v19 = vld [vmem:[%s604_s4] ss:$0 sm:$0xff] }
   0x7   :  { %144 = vmatpush.msra.mxu1 %v98_v4  ;;  %169 = vmatpush.msra.mxu2 %v98_v4 }
   0x8   :  { %120 = vmatpush.msra.mxu0 %v97_v6  ;;  %192 = vmatpush.msra.mxu3 %v100_v1 }
   0x9   :  { %121 = vmatmul.f32.vlgmr.msra.gmra.mxu0 %v420_v8  ;;  %145 = vmatpush.msra.mxu1 %v97_v6  ;;  %v517_v28 = vld [vmem:[#allocation2] ss:$0 sm:$0xff] }
   0xa   :  { %41 = vperm.xlu0 %380, %v26_v7   ;;  %170 = vmatpush.msra.mxu2 %v97_v6 }
   0xb   :  { %193 = vmatpush.msra.mxu3 %v99_v3  ;;  %217 = vmatpush.msrb.mxu0 %v100_v1 }
   0xc   :  { %61 = vperm.xlu2 %382, %v30_v9   ;;  %242 = vmatpush.msrb.mxu1 %v100_v1 }
   0xd   :  { %194 = vmatpush.msra.mxu3 %v98_v4  ;;  %218 = vmatpush.msrb.mxu0 %v99_v3 }
   0xe   :  { %243 = vmatpush.msrb.mxu1 %v99_v3  ;;  %267 = vmatpush.msrb.mxu2 %v100_v1 }
   0xf   :  { %195 = vmatpush.msra.mxu3 %v97_v6  ;;  %219 = vmatpush.msrb.mxu0 %v98_v4 }
  0x10   :  { %244 = vmatpush.msrb.mxu1 %v98_v4  ;;  %268 = vmatpush.msrb.mxu2 %v99_v3 }
  0x11   :  { %220 = vmatpush.msrb.mxu0 %v97_v6  ;;  %292 = vmatpush.msrb.mxu3 %v100_v1 }
  0x12   :  { %66 = vperm.xlu0 %380, %v31_v10   ;;  %245 = vmatpush.msrb.mxu1 %v97_v6 }
  0x13   :  { %269 = vmatpush.msrb.mxu2 %v98_v4  ;;  %293 = vmatpush.msrb.mxu3 %v99_v3 }
  0x14   :  { %46 = vperm.xlu1 %381, %v27_v23  }
  0x15   :  { %270 = vmatpush.msrb.mxu2 %v97_v6  ;;  %294 = vmatpush.msrb.mxu3 %v98_v4 }
  0x17   :  { %295 = vmatpush.msrb.mxu3 %v97_v6 }
  0x1c   :  { %51 = vperm.xlu1 %381, %v28_v25  }
  0x24   :  { %71 = vperm.xlu1 %381, %v32_v27  }
  0x5e   :  { %v57_v24 = vpop.permute.xlu2 %56 }
  0x5f   :  { %v81_v0 = vmul.f32 %v489_v12, %v57_v24 }
  0x61   :  { %v93_v3 = vadd.f32 %v495_v15, %v81_v0 }
  0x66   :  { %v512_v26 = vpop.permute.xlu2 %61 }
  0x74   :  { %v37_v13 = vpop.permute.xlu0 %36 }
  0x75   :  { %v77_v14 = vmul.f32 %v489_v12, %v37_v13  ;;  %v82_v13 = vmul.f32 %v489_v12, %v512_v26 }
  0x77   :  { %v89_v16 = vadd.f32 %v495_v15, %v77_v14  ;;  %v94_v14 = vadd.f32 %v495_v15, %v82_v13 }
  0x7c   :  { %v42_v30 = vpop.permute.xlu0 %41 }
  0x7d   :  { %v78_v32 = vmul.f32 %v489_v12, %v42_v30 }
  0x7f   :  { %v90_v33 = vadd.f32 %v495_v15, %v78_v32 }
  0x84   :  { %v529_v40 = vpop.permute.xlu0 %66 }
  0x85   :  { %v83_v25 = vmul.f32 %v489_v12, %v529_v40 }
  0x86   :  { %v122_v17 = vpop.f32.mrf.mxu0  ;;  %v47_v43 = vpop.permute.xlu1 %46 }
  0x87   :  { %v125_v18 = vadd.f32 %v122_v17, %v89_v16  ;;  %v79_v44 = vmul.f32 %v489_v12, %v47_v43  ;;  %v95_v27 = vadd.f32 %v495_v15, %v83_v25 }
  0x89   :  { %387 = vtanh.f32 %v125_v18  ;;  %v91_v46 = vadd.f32 %v495_v15, %v79_v44 }
  0x8e   :  { %v52_v52 = vpop.permute.xlu1 %51 }
  0x8f   :  { %v388_v20 = vpop.eup %387  ;;  %v80_v56 = vmul.f32 %v489_v12, %v52_v52 }
  0x90   :  { %371 = vmatmul.msk.f32.vlgmr.msra.gmra.mxu1 %vm101_vm0, %v388_v20  ;;  %v306_v21 = vmul.f32 %v388_v20, %v501_v19 }
  0x91   :  { %v92_v58 = vadd.f32 %v495_v15, %v80_v56 }
  0x92   :  { %v314_v22 = vsel %vm101_vm0, %v306_v21, 0.0 }
  0x93   :  { %315 = vadd.xlane.f32.xlu2 %v314_v22 }
  0x96   :  { %v541_v53 = vpop.permute.xlu1 %71 }
 0x106   :  { %v316_v29 = vpop.xlane.xlu2 %315 }
 0x107   :  { %v342_v31 = vadd.f32 %v517_v28, %v316_v29 }
 0x109   :  { %389 = vtanh.f32 %v342_v31 }
 0x10d   :  { %v147_v34 = vpop.f32.mrf.mxu1 }
 0x10e   :  { %v150_v35 = vadd.f32 %v147_v34, %v90_v33 }
 0x10f   :  { %v390_v36 = vpop.eup %389 }
 0x110   :  { %359 = vst.msk [vmem:[%s606_s6] sm:$0xff] %vm358_vm1, %v390_v36  ;;  %391 = vtanh.f32 %v150_v35  ;;  %v84_v36 = vmul.f32 %v489_v12, %v541_v53 }
 0x116   :  { %v392_v37 = vpop.eup %391 }
 0x117   :  { %372 = vmatmul.msk.f32.vlgmr.msra.gmra.mxu2 %vm101_vm0, %v392_v37  ;;  %v307_v38 = vmul.f32 %v392_v37, %v501_v19 }
 0x119   :  { %v317_v39 = vsel %vm101_vm0, %v307_v38, 0.0  ;;  %v96_v38 = vadd.f32 %v495_v15, %v84_v36 }
 0x11a   :  { %318 = vadd.xlane.f32.xlu0 %v317_v39 }
 0x18d   :  { %v319_v41 = vpop.xlane.xlu0 %318 }
 0x18e   :  { %v343_v42 = vadd.f32 %v517_v28, %v319_v41 }
 0x190   :  { %393 = vtanh.f32 %v343_v42 }
 0x196   :  { %v394_v45 = vpop.eup %393 }
 0x197   :  { %360 = vst.msk [vmem:[%s606_s6 + $0x8] sm:$0xff] %vm358_vm1, %v394_v45 }
 0x19a   :  { %v172_v47 = vpop.f32.mrf.mxu2 }
 0x19b   :  { %v175_v48 = vadd.f32 %v172_v47, %v91_v46 }
 0x19d   :  { %395 = vtanh.f32 %v175_v48 }
 0x1a3   :  { %v396_v49 = vpop.eup %395 }
 0x1a4   :  { %373 = vmatmul.msk.f32.vlgmr.msra.gmra.mxu3 %vm101_vm0, %v396_v49  ;;  %v308_v50 = vmul.f32 %v396_v49, %v501_v19 }
 0x1a6   :  { %v320_v51 = vsel %vm101_vm0, %v308_v50, 0.0 }
 0x1a7   :  { %321 = vadd.xlane.f32.xlu1 %v320_v51 }
 0x21a   :  { %v322_v54 = vpop.xlane.xlu1 %321 }
 0x21b   :  { %v344_v55 = vadd.f32 %v517_v28, %v322_v54 }
 0x21d   :  { %397 = vtanh.f32 %v344_v55 }
 0x223   :  { %v398_v57 = vpop.eup %397 }
 0x224   :  { %361 = vst.msk [vmem:[%s606_s6 + $0x10] sm:$0xff] %vm358_vm1, %v398_v57 }
 0x227   :  { %v197_v59 = vpop.f32.mrf.mxu3 }
 0x228   :  { %v200_v60 = vadd.f32 %v197_v59, %v92_v58 }
 0x22a   :  { %399 = vtanh.f32 %v200_v60 }
 0x230   :  { %v400_v61 = vpop.eup %399 }
 0x231   :  { %374 = vmatmul.msk.f32.vlgmr.msrb.gmra.mxu0 %vm101_vm0, %v400_v61  ;;  %v309_v62 = vmul.f32 %v400_v61, %v501_v19 }
 0x233   :  { %v323_v63 = vsel %vm101_vm0, %v309_v62, 0.0 }
 0x234   :  { %324 = vadd.xlane.f32.xlu2 %v323_v63 }
 0x2a7   :  { %v325_v1 = vpop.xlane.xlu2 %324 }
 0x2a8   :  { %v345_v2 = vadd.f32 %v517_v28, %v325_v1 }
 0x2aa   :  { %401 = vtanh.f32 %v345_v2 }
 0x2ae   :  { %v222_v4 = vpop.f32.mrf.mxu0 }
 0x2af   :  { %v225_v5 = vadd.f32 %v222_v4, %v93_v3 }
 0x2b0   :  { %v402_v6 = vpop.eup %401 }
 0x2b1   :  { %362 = vst.msk [vmem:[%s606_s6 + $0x18] sm:$0xff] %vm358_vm1, %v402_v6  ;;  %403 = vtanh.f32 %v225_v5 }
 0x2b7   :  { %v404_v7 = vpop.eup %403 }
 0x2b8   :  { %375 = vmatmul.msk.f32.vlgmr.msrb.gmra.mxu1 %vm101_vm0, %v404_v7  ;;  %v310_v8 = vmul.f32 %v404_v7, %v501_v19 }
 0x2ba   :  { %v326_v9 = vsel %vm101_vm0, %v310_v8, 0.0 }
 0x2bb   :  { %327 = vadd.xlane.f32.xlu2 %v326_v9 }
 0x32e   :  { %v328_v10 = vpop.xlane.xlu2 %327 }
 0x32f   :  { %v346_v11 = vadd.f32 %v517_v28, %v328_v10 }
 0x331   :  { %405 = vtanh.f32 %v346_v11 }
 0x335   :  { %v247_v16 = vpop.f32.mrf.mxu1 }
 0x336   :  { %v250_v17 = vadd.f32 %v247_v16, %v94_v14 }
 0x337   :  { %v406_v18 = vpop.eup %405 }
 0x338   :  { %363 = vst.msk [vmem:[%s606_s6 + $0x20] sm:$0xff] %vm358_vm1, %v406_v18  ;;  %407 = vtanh.f32 %v250_v17 }
 0x33e   :  { %v408_v20 = vpop.eup %407 }
 0x33f   :  { %376 = vmatmul.msk.f32.vlgmr.msrb.gmra.mxu2 %vm101_vm0, %v408_v20  ;;  %v311_v21 = vmul.f32 %v408_v20, %v501_v19 }
 0x341   :  { %v329_v22 = vsel %vm101_vm0, %v311_v21, 0.0 }
 0x342   :  { %330 = vadd.xlane.f32.xlu0 %v329_v22 }
 0x3b5   :  { %v331_v23 = vpop.xlane.xlu0 %330 }
 0x3b6   :  { %v347_v24 = vadd.f32 %v517_v28, %v331_v23 }
 0x3b8   :  { %409 = vtanh.f32 %v347_v24 }
 0x3be   :  { %v410_v26 = vpop.eup %409 }
 0x3bf   :  { %364 = vst.msk [vmem:[%s606_s6 + $0x28] sm:$0xff] %vm358_vm1, %v410_v26 }
 0x3c2   :  { %v272_v29 = vpop.f32.mrf.mxu2 }
 0x3c3   :  { %v275_v30 = vadd.f32 %v272_v29, %v95_v27 }
 0x3c5   :  { %411 = vtanh.f32 %v275_v30 }
 0x3cb   :  { %v412_v31 = vpop.eup %411 }
 0x3cc   :  { %377 = vmatmul.msk.f32.vlgmr.msrb.gmra.mxu3 %vm101_vm0, %v412_v31  ;;  %v312_v32 = vmul.f32 %v412_v31, %v501_v19 }
 0x3ce   :  { %v332_v33 = vsel %vm101_vm0, %v312_v32, 0.0 }
 0x3cf   :  { %333 = vadd.xlane.f32.xlu1 %v332_v33 }
 0x442   :  { %v334_v34 = vpop.xlane.xlu1 %333 }
 0x443   :  { %v348_v35 = vadd.f32 %v517_v28, %v334_v34 }
 0x445   :  { %413 = vtanh.f32 %v348_v35 }
 0x44b   :  { %v414_v37 = vpop.eup %413 }
 0x44c   :  { %365 = vst.msk [vmem:[%s606_s6 + $0x30] sm:$0xff] %vm358_vm1, %v414_v37 }
 0x44f   :  { %v297_v39 = vpop.f32.mrf.mxu3 }
 0x450   :  { %v300_v40 = vadd.f32 %v297_v39, %v96_v38 }
 0x452   :  { %415 = vtanh.f32 %v300_v40 }
 0x458   :  { %v416_v41 = vpop.eup %415 }
 0x459   :  { %v313_v42 = vmul.f32 %v416_v41, %v501_v19 }
 0x45b   :  { %v335_v43 = vsel %vm101_vm0, %v313_v42, 0.0 }
 0x45c   :  { %336 = vadd.xlane.f32.xlu2 %v335_v43 }
 0x4cf   :  { %v337_v44 = vpop.xlane.xlu2 %336 }
 0x4d0   :  { %v349_v12 = vadd.f32 %v517_v28, %v337_v44 }
 0x4d2   :  { %417 = vtanh.f32 %v349_v12 }
 0x4d8   :  { %v418_v45 = vpop.eup %417 }
 0x4d9   :  { %366 = vst.msk [vmem:[%s606_s6 + $0x38] sm:$0xff] %vm358_vm1, %v418_v45 }

</bundles_post_ra>
